<compile_context>
chip_gen: v6e
topology: v6e:2x2x1
jax: 0.10.0
libtpu: 0.0.40
codegen_flags: <defaults>
</compile_context>

<pallas_src>
import math
import functools

import jax
import jax.numpy as jnp
from jax.experimental import pallas as pl
from jax.experimental.pallas import tpu as pltpu


def _round_up(x, m):
    return (x + m - 1) // m * m


def _pad2d(a, rows, cols):
    pr, pc = rows - a.shape[0], cols - a.shape[1]
    if pr or pc:
        a = jnp.pad(a, ((0, pr), (0, pc)))
    return a


def _choose_tiling(n):
    """Pick (N_pad, TM, TK). Large tiles for DMA efficiency; small graphs -> one tile."""
    n128 = _round_up(n, 128)
    if n128 <= 512:
        # Tiny graph: a single (N_pad, N_pad) tile; grid is (1, 1).
        return n128, n128, n128
    n_pad = _round_up(n, 512)
    tm = 512                      # keeps N_pad/TM >= 2 -> megacore sharding on v7x
    tk = 512
    for cand in (2048, 1024):
        if n_pad % cand == 0:
            tk = cand
            break
    return n_pad, tm, tk


def gcn_kernel(adj_ref, x_ref, h0_ref, w_ref, out_ref, *, alpha, tk, x_resident):
    """grid = (row_tiles, k_tiles); k is the contraction axis of adj @ x.

    out_ref is f32 and resident over k (constant (i, 0) index map), so the partial
    hi accumulation goes straight into it -- no separate accumulator scratch.
    """
    k = pl.program_id(1)

    @pl.when(k == 0)
    def _init():
        out_ref[...] = jnp.zeros_like(out_ref)

    if x_resident:
        # x lives fully in VMEM; slice the k-th row block in-kernel.
        x_tile = x_ref[pl.ds(pl.multiple_of(k * tk, tk), tk), :]
    else:
        x_tile = x_ref[...]

    # Partial hi accumulation: out += adj_tile @ x_tile (bf16 MXU, f32 accumulate).
    out_ref[...] += jnp.dot(adj_ref[...], x_tile,
                            preferred_element_type=jnp.float32)

    @pl.when(k == pl.num_programs(1) - 1)
    def _finalize():
        # support = (1-alpha)*hi + alpha*h0   (f32 VPU blend)
        support = (1.0 - alpha) * out_ref[...] + alpha * h0_ref[...]
        # output = support @ (theta*W + (1-theta)*I); theta folded in the wrapper.
        # Epilogue matmul in bf16 (w_ref dtype), f32 result.
        out_ref[...] = jnp.dot(support.astype(w_ref.dtype), w_ref[...],
                               preferred_element_type=jnp.float32)


def graph_convolution(adj, x, h0, weight, *, lamda, alpha, l,
                      compute_dtype=jnp.bfloat16):
    """Pallas forward for GraphConvolution(variant=False, residual=False).

    Pass `adj` already cast to `compute_dtype` to skip the per-layer cast
    (GCNII reuses the same adjacency for every layer).
    """
    theta = min(1.0, math.log(lamda / l + 1.0))
    N, F_in = x.shape
    F_out = weight.shape[1]
    assert F_in == F_out, "non-variant GCNII layer requires in_features == out_features"

    F_pad = _round_up(F_in, 128)
    N_pad, TM, TK = _choose_tiling(N)
    itemsize = jnp.dtype(compute_dtype).itemsize

    # Cast BEFORE padding so the pre-pass moves 2 bytes/elem of adj, not 8+.
    # (astype is a no-op if the caller already hoisted the bf16 cast.)
    adj_p = _pad2d(adj.astype(compute_dtype), N_pad, N_pad)
    x_p = _pad2d(x.astype(compute_dtype), N_pad, F_pad)
    h0_p = _pad2d(h0.astype(jnp.float32), N_pad, F_pad)

    # Fold theta into the weight: out = support @ (theta*W + (1-theta)*I).
    # Padded rows/cols of W are zero; support's padded columns are zero, so the
    # identity entries beyond F contribute nothing (output is sliced back anyway).
    w_p = _pad2d(weight.astype(jnp.float32), F_pad, F_pad)
    w_fold = (theta * w_p
              + (1.0 - theta) * jnp.eye(F_pad, dtype=jnp.float32)
              ).astype(compute_dtype)

    # x residency: keep the whole x matrix in VMEM (constant index map) unless its
    # (double-buffered) footprint would blow a v7x-safe budget.
    x_resident_bytes = 2 * N_pad * F_pad * itemsize
    x_resident = x_resident_bytes <= (24 << 20)

    grid = (N_pad // TM, N_pad // TK)
    kernel = functools.partial(gcn_kernel, alpha=float(alpha), tk=TK,
                               x_resident=x_resident)

    if x_resident:
        x_spec = pl.BlockSpec((N_pad, F_pad), lambda i, k: (0, 0))   # fetched once
        x_bytes = N_pad * F_pad * itemsize
        x_vmem = x_resident_bytes
    else:
        x_spec = pl.BlockSpec((TK, F_pad), lambda i, k: (k, 0))      # refetched per row tile
        x_bytes = N_pad * F_pad * itemsize * grid[0]
        x_vmem = 2 * TK * F_pad * itemsize

    # Advisory cost hint for XLA scheduling around the custom call.
    cost = pl.CostEstimate(
        flops=2 * N_pad * N_pad * F_pad + 2 * N_pad * F_pad * F_pad,
        transcendentals=0,
        bytes_accessed=(N_pad * N_pad * itemsize       # adj
                        + x_bytes                      # x
                        + N_pad * F_pad * 4            # h0
                        + F_pad * F_pad * itemsize     # folded W (bf16)
                        + N_pad * F_pad * 4),          # out
    )

    # Generation-aware VMEM budget (double-buffered tiles + resident x + headroom).
    vmem_needed = (2 * TM * TK * itemsize          # adj tiles
                   + x_vmem                        # x (resident or blocked)
                   + 2 * TM * F_pad * 4            # h0 tiles
                   + 2 * F_pad * F_pad * itemsize  # folded W (bf16)
                   + 2 * TM * F_pad * 4)           # out tile (f32, resident over k)
    try:
        vmem_cap = int(pltpu.get_tpu_info().vmem_capacity_bytes)
    except Exception:
        vmem_cap = 64 << 20                        # v7x per-TC physical (smallest gen)
    vmem_limit = min(int(vmem_needed) + (8 << 20), vmem_cap - (8 << 20))
    vmem_limit = max(vmem_limit, int(vmem_needed) + (2 << 20))

    out = pl.pallas_call(
        kernel,
        out_shape=jax.ShapeDtypeStruct((N_pad, F_pad), jnp.float32),
        grid_spec=pltpu.PrefetchScalarGridSpec(
            num_scalar_prefetch=0,
            grid=grid,
            in_specs=[
                pl.BlockSpec((TM, TK), lambda i, k: (i, k)),        # adj tile
                x_spec,                                             # x (resident/blocked)
                pl.BlockSpec((TM, F_pad), lambda i, k: (i, 0)),     # h0 rows (resident over k)
                pl.BlockSpec((F_pad, F_pad), lambda i, k: (0, 0)),  # folded W (resident)
            ],
            out_specs=pl.BlockSpec((TM, F_pad), lambda i, k: (i, 0)),
        ),
        compiler_params=pltpu.CompilerParams(
            dimension_semantics=("parallel", "arbitrary"),
            vmem_limit_bytes=int(vmem_limit),
        ),
        cost_estimate=cost,
    )(adj_p, x_p, h0_p, w_fold)

    return out[:N, :F_out].astype(x.dtype)


def reference(adj, x, h0, weight, *, lamda, alpha, l):
    theta = min(1.0, math.log(lamda / l + 1.0))
    hi = adj @ x
    support = (1.0 - alpha) * hi + alpha * h0
    return theta * (support @ weight) + (1.0 - theta) * support


if __name__ == "__main__":
    key = jax.random.PRNGKey(0)
    N = 128          # number of graph nodes
    F = 32           # in_features == out_features (required for non-variant GCNII)
    lamda, alpha, l = 0.5, 0.1, 2

    k_adj, k_x, k_h0, k_w = jax.random.split(key, 4)
    adj = jax.random.uniform(k_adj, (N, N), jnp.float32)
    # row-normalize like a typical GCN adjacency
    adj = adj / jnp.sum(adj, axis=1, keepdims=True)
    x = jax.random.normal(k_x, (N, F), jnp.float32)
    h0 = jax.random.normal(k_h0, (N, F), jnp.float32)

    # weight init matching reset_parameters(): U(-stdv, stdv), stdv = 1/sqrt(out_features)
    stdv = 1.0 / math.sqrt(F)
    weight = jax.random.uniform(k_w, (F, F), jnp.float32, minval=-stdv, maxval=stdv)

    out = graph_convolution(adj, x, h0, weight, lamda=lamda, alpha=alpha, l=l)
    out = jax.block_until_ready(out)

    ref = reference(adj, x, h0, weight, lamda=lamda, alpha=alpha, l=l)
    assert out.shape == (N, F)
    # adj/x (and the epilogue matmul) run in bf16 with f32 accumulation, so compare
    # at bf16-level tolerance against the pure-f32 reference.
    max_err = float(jnp.max(jnp.abs(out - ref)))
    assert jnp.allclose(out, ref, atol=2e-2, rtol=2e-2), max_err

    print("KERNEL_OK")
</pallas_src>

<mosaic_0001>
module attributes {stable_mosaic.version = 11 : i64} {
  func.func @gcn_kernel(%arg0: i32, %arg1: i32, %arg2: memref<128x128xbf16, #tpu.memory_space<vmem>>, %arg3: memref<128x128xbf16, #tpu.memory_space<vmem>>, %arg4: memref<128x128xf32, #tpu.memory_space<vmem>>, %arg5: memref<128x128xbf16, #tpu.memory_space<vmem>>, %arg6: memref<128x128xf32, #tpu.memory_space<vmem>>) attributes {dimension_semantics = [#tpu.dimension_semantics<parallel>, #tpu.dimension_semantics<arbitrary>], iteration_bounds = array<i64: 1, 1>, scalar_prefetch = 0 : i64, scratch_operands = 0 : i64, tpu.core_type = #tpu.core_type<tc>, window_params = [{transform_indices = @transform_0, window_bounds = array<i64: 128, 128>}, {pipeline_mode = #tpu.pipeline_mode<synchronous>, transform_indices = @transform_1, window_bounds = array<i64: 128, 128>}, {transform_indices = @transform_2, window_bounds = array<i64: 128, 128>}, {pipeline_mode = #tpu.pipeline_mode<synchronous>, transform_indices = @transform_3, window_bounds = array<i64: 128, 128>}, {transform_indices = @transform_4, window_bounds = array<i64: 128, 128>}]} {
    %c0_i32 = arith.constant 0 : i32
    %0 = arith.cmpi eq, %arg1, %c0_i32 : i32
    %1 = arith.extui %0 : i1 to i32
    %c0_i32_0 = arith.constant 0 : i32
    %2 = arith.cmpi ne, %1, %c0_i32_0 : i32
    scf.if %2 {
      %cst_9 = arith.constant 0.000000e+00 : f32
      %15 = vector.broadcast %cst_9 : f32 to vector<128x128xf32>
      %c0_10 = arith.constant 0 : index
      %c0_11 = arith.constant 0 : index
      %16 = vector.load %arg6[%c0_10, %c0_11] : memref<128x128xf32, #tpu.memory_space<vmem>>, vector<128x128xf32>
      tpu.vector_store %arg6[%c0_10, %c0_11], %15 {strides = array<i32>} : memref<128x128xf32, #tpu.memory_space<vmem>>, vector<128x128xf32>,
    } else {
    }
    %c128_i32 = arith.constant 128 : i32
    %3 = arith.muli %arg1, %c128_i32 : i32
    %4 = tpu.assume_multiple %3, 128 : i32
    %5 = arith.index_cast %4 : i32 to index
    %c0 = arith.constant 0 : index
    %6 = vector.load %arg3[%5, %c0] : memref<128x128xbf16, #tpu.memory_space<vmem>>, vector<128x128xbf16>
    %c0_1 = arith.constant 0 : index
    %c0_2 = arith.constant 0 : index
    %7 = vector.load %arg6[%c0_1, %c0_2] : memref<128x128xf32, #tpu.memory_space<vmem>>, vector<128x128xf32>
    %c0_3 = arith.constant 0 : index
    %c0_4 = arith.constant 0 : index
    %8 = vector.load %arg2[%c0_3, %c0_4] : memref<128x128xbf16, #tpu.memory_space<vmem>>, vector<128x128xbf16>
    %cst = arith.constant dense<0.000000e+00> : vector<128x128xf32>
    %9 = tpu.matmul %8, %6, %cst {dimension_numbers = #tpu.dot_dimension_numbers<[1], [0], [0], [1], [0, 0, 1, 1], [], []>} : vector<128x128xbf16>, vector<128x128xbf16>, vector<128x128xf32> -> vector<128x128xf32>
    %10 = arith.addf %7, %9 : vector<128x128xf32>
    %c0_5 = arith.constant 0 : index
    %c0_6 = arith.constant 0 : index
    %11 = vector.load %arg6[%c0_5, %c0_6] : memref<128x128xf32, #tpu.memory_space<vmem>>, vector<128x128xf32>
    tpu.vector_store %arg6[%c0_5, %c0_6], %10 {strides = array<i32>} : memref<128x128xf32, #tpu.memory_space<vmem>>, vector<128x128xf32>,
    %c0_i32_7 = arith.constant 0 : i32
    %12 = arith.cmpi eq, %arg1, %c0_i32_7 : i32
    %13 = arith.extui %12 : i1 to i32
    %c0_i32_8 = arith.constant 0 : i32
    %14 = arith.cmpi ne, %13, %c0_i32_8 : i32
    scf.if %14 {
      %c0_9 = arith.constant 0 : index
      %c0_10 = arith.constant 0 : index
      %15 = vector.load %arg6[%c0_9, %c0_10] : memref<128x128xf32, #tpu.memory_space<vmem>>, vector<128x128xf32>
      %cst_11 = arith.constant 0.899999976 : f32
      %16 = vector.broadcast %cst_11 : f32 to vector<128x128xf32>
      %17 = arith.mulf %16, %15 : vector<128x128xf32>
      %c0_12 = arith.constant 0 : index
      %c0_13 = arith.constant 0 : index
      %18 = vector.load %arg4[%c0_12, %c0_13] : memref<128x128xf32, #tpu.memory_space<vmem>>, vector<128x128xf32>
      %cst_14 = arith.constant 1.000000e-01 : f32
      %19 = vector.broadcast %cst_14 : f32 to vector<128x128xf32>
      %20 = arith.mulf %19, %18 : vector<128x128xf32>
      %21 = arith.addf %17, %20 : vector<128x128xf32>
      %22 = arith.truncf %21 : vector<128x128xf32> to vector<128x128xbf16>
      %c0_15 = arith.constant 0 : index
      %c0_16 = arith.constant 0 : index
      %23 = vector.load %arg5[%c0_15, %c0_16] : memref<128x128xbf16, #tpu.memory_space<vmem>>, vector<128x128xbf16>
      %cst_17 = arith.constant dense<0.000000e+00> : vector<128x128xf32>
      %24 = tpu.matmul %22, %23, %cst_17 {dimension_numbers = #tpu.dot_dimension_numbers<[1], [0], [0], [1], [0, 0, 1, 1], [], []>} : vector<128x128xbf16>, vector<128x128xbf16>, vector<128x128xf32> -> vector<128x128xf32>
      %c0_18 = arith.constant 0 : index
      %c0_19 = arith.constant 0 : index
      %25 = vector.load %arg6[%c0_18, %c0_19] : memref<128x128xf32, #tpu.memory_space<vmem>>, vector<128x128xf32>
      tpu.vector_store %arg6[%c0_18, %c0_19], %24 {strides = array<i32>} : memref<128x128xf32, #tpu.memory_space<vmem>>, vector<128x128xf32>,
    } else {
    }
    return
  }
  func.func @transform_0(%arg0: i32, %arg1: i32) -> (i32, i32) {
    %c0_i32 = arith.constant 0 : i32
    return %arg0, %arg1 : i32, i32
  }
  func.func @transform_1(%arg0: i32, %arg1: i32) -> (i32, i32) {
    %c0_i32 = arith.constant 0 : i32
    %c0_i32_0 = arith.constant 0 : i32
    %c0_i32_1 = arith.constant 0 : i32
    return %c0_i32, %c0_i32_0 : i32, i32
  }
  func.func @transform_2(%arg0: i32, %arg1: i32) -> (i32, i32) {
    %c0_i32 = arith.constant 0 : i32
    %c0_i32_0 = arith.constant 0 : i32
    return %arg0, %c0_i32 : i32, i32
  }
  func.func @transform_3(%arg0: i32, %arg1: i32) -> (i32, i32) {
    %c0_i32 = arith.constant 0 : i32
    %c0_i32_0 = arith.constant 0 : i32
    %c0_i32_1 = arith.constant 0 : i32
    return %c0_i32, %c0_i32_0 : i32, i32
  }
  func.func @transform_4(%arg0: i32, %arg1: i32) -> (i32, i32) {
    %c0_i32 = arith.constant 0 : i32
    %c0_i32_0 = arith.constant 0 : i32
    return %arg0, %c0_i32 : i32, i32
  }
}

</mosaic_0001>

<bundles_post_ra>
// kernel: tpu_custom_call.1
= control target key start
LH: loop header
LB: loop body
LE: loop exit
PB: predicated region body
PF: predicated region fallthrough
CT: control target
= control target key end

     0   :  { %9 = vsyncpa [#allocation3], 0  ;;  %s987_s0 = inlined_call_operand.hbm [shape: bf16[128,128], index: 0, kind: input, shape index: {}]   ;;  %s988_s1 = inlined_call_operand.hbm [shape: bf16[128,128], index: 1, kind: input, shape index: {}]   ;;  %s989_s2 = inlined_call_operand.hbm [shape: f32[128,128], index: 2, kind: input, shape index: {}]   ;;  %s990_s3 = inlined_call_operand.hbm [shape: bf16[128,128], index: 3, kind: input, shape index: {}]   ;;  %s991_s4 = inlined_call_operand.hbm [shape: f32[128,128], index: 4, kind: output, shape index: {}]  }
   0x1   :  { %10 = vsyncpa [#allocation6], 0 }
   0x2   :  { %11 = vsyncpa [#allocation9], 0 }
   0x3   :  { %12 = vsyncpa [#allocation4], 0  ;;  %s923_s15 = smov [#allocation5]   ;;  %s924_s17 = smov [#allocation2]  }
   0x4   :  { %s30_s16 = sshll.u32 %s923_s15, 4  ;;  %s18_s18 = sshll.u32 %s924_s17, 4  ;;  %s31_s16 = int_to_ptr.vmem [resolvable:$true] %s30_s16  ;;  %s19_s18 = int_to_ptr.vmem [resolvable:$true] %s18_s18 }
   0x5   :  { %s823_s19 = scalar_lea.vmem %s31_s16, 1024  ;;  %p828_p1 = scmp.lt.s32.totalorder %s31_s16, %s31_s16 }
   0x6   :  { %p824_p0 = scmp.ne.s32.totalorder %s31_s16, %s823_s19  ;;  %p829_p2 = scmp.lt.s32.totalorder %s823_s19, %s823_s19 }
   0x8   :  { %p830_p3 = por %p829_p2, %p828_p1 }
   0xa   :  { %p831_p4 = pnand %p830_p3, %p824_p0 }
   0xc   :  { %834 = shalt.err (!%p831_p4)
}
   0xd   :  { %s925_s20 = smov 64   ;;  %s926_s21 = smov 4  }
   0xe   :  { %36 = dma.hbm_to_vmem [thread:$0]  %s988_s1, 1024, %s31_s16, [#allocation6], %s925_s20, %s925_s20, %s926_s21  }
   0xf   :  { %s843_s24 = scalar_lea.vmem %s19_s18, 1024  ;;  %p848_p6 = scmp.lt.s32.totalorder %s19_s18, %s19_s18 }
  0x10   :  { %p844_p5 = scmp.ne.s32.totalorder %s19_s18, %s843_s24  ;;  %p849_p7 = scmp.lt.s32.totalorder %s843_s24, %s843_s24 }
  0x12   :  { %p850_p8 = por %p849_p7, %p848_p6 }
  0x14   :  { %p851_p9 = pnand %p850_p8, %p844_p5 }
  0x16   :  { %854 = shalt.err (!%p851_p9)
}
  0x17   :  { %24 = dma.hbm_to_vmem [thread:$0]  %s987_s0, 1024, %s19_s18, [#allocation3], %s925_s20, %s925_s20, %s926_s21  }
  0x18   :  { %s927_s27 = smov [#allocation7]  }
  0x19   :  { %s42_s28 = sshll.u32 %s927_s27, 4  ;;  %s43_s28 = int_to_ptr.vmem [resolvable:$true] %s42_s28 }
  0x1a   :  { %s863_s29 = scalar_lea.vmem %s43_s28, 2048  ;;  %p868_p11 = scmp.lt.s32.totalorder %s43_s28, %s43_s28 }
  0x1b   :  { %p864_p10 = scmp.ne.s32.totalorder %s43_s28, %s863_s29  ;;  %p869_p12 = scmp.lt.s32.totalorder %s863_s29, %s863_s29 }
  0x1d   :  { %p870_p13 = por %p869_p12, %p868_p11 }
  0x1f   :  { %p871_p0 = pnand %p870_p13, %p864_p10 }
  0x21   :  { %874 = shalt.err (!%p871_p0)
}
  0x22   :  { %s928_s1 = smov 128   ;;  %s929_s30 = smov 8  }
  0x23   :  { %48 = dma.hbm_to_vmem [thread:$0]  %s989_s2, 2048, %s43_s28, [#allocation6], %s928_s1, %s928_s1, %s929_s30  }
  0x24   :  { %s930_s0 = smov [#allocation8]  }
  0x25   :  { %s54_s7 = sshll.u32 %s930_s0, 4  ;;  %s55_s7 = int_to_ptr.vmem [resolvable:$true] %s54_s7 }
  0x26   :  { %s883_s8 = scalar_lea.vmem %s55_s7, 1024  ;;  %p888_p2 = scmp.lt.s32.totalorder %s55_s7, %s55_s7 }
  0x27   :  { %p884_p1 = scmp.ne.s32.totalorder %s55_s7, %s883_s8  ;;  %p889_p3 = scmp.lt.s32.totalorder %s883_s8, %s883_s8 }
  0x29   :  { %p890_p4 = por %p889_p3, %p888_p2 }
  0x2b   :  { %p891_p5 = pnand %p890_p4, %p884_p1 }
  0x2d   :  { %894 = shalt.err (!%p891_p5)
}
  0x2e   :  { %60 = dma.hbm_to_vmem [thread:$0]  %s990_s3, 1024, %s55_s7, [#allocation9], %s925_s20, %s925_s20, %s926_s21  }
  0x2f   :  { %915 = dma.done.wait [#allocation3], 1024  }
  0x30   :  { %916 = vsyncadd [#allocation3], 4294966272 }
  0x31   :  { %917 = dma.done.wait [#allocation6], 3072  }
  0x32   :  { %918 = vsyncadd [#allocation6], 4294964224 }
  0x33   :  { %919 = dma.done.wait [#allocation9], 1024  }
  0x34   :  { %920 = vsyncadd [#allocation9], 4294966272  ;;  %v791_v0 = vld [vmem:[#allocation5 + $0x38] sm:$0xff]   ;;  %v792_v1 = vld [vmem:[#allocation5 + $0x30] sm:$0xff]   ;;  %s931_s2 = smov [#allocation10]  }
  0x35   :  { %717 = vmatprep.subr.bf16.mxu0 %v791_v0  ;;  %v793_v2 = vld [vmem:[#allocation5 + $0x28] sm:$0xff]   ;;  %v794_v3 = vld [vmem:[#allocation5 + $0x20] sm:$0xff]   ;;  %v795_v5 = vld [vmem:[#allocation5 + $0x18] sm:$0xff]   ;;  %s645_s3 = sshll.u32 %s931_s2, 4  ;;  %s646_s3 = int_to_ptr.vmem [resolvable:$true] %s645_s3 }
  0x36   :  { %718 = vmatpush3.bf16.msra.mxu0 %v791_v0  ;;  %v799_v4 = vld [vmem:[#allocation2] sm:$0xff]   ;;  %v796_v6 = vld [vmem:[#allocation5 + $0x10] sm:$0xff]   ;;  %v807_v7 = vld [vmem:[#allocation8 + $0x38] sm:$0xff]   ;;  %s895_s11 = scalar_lea.vmem %s646_s3, 2048  ;;  %p900_p7 = scmp.lt.s32.totalorder %s646_s3, %s646_s3 }
  0x37   :  { %719 = vmatprep.subr.bf16.mxu0 %v792_v1  ;;  %733 = vmatprep.mubr.bf16.mxu0 %v799_v4  ;;  %v808_v8 = vld [vmem:[#allocation8 + $0x30] sm:$0xff]   ;;  %v797_v9 = vld [vmem:[#allocation5 + $0x8] sm:$0xff]   ;;  %v798_v10 = vld [vmem:[#allocation5] sm:$0xff]   ;;  %p896_p6 = scmp.ne.s32.totalorder %s646_s3, %s895_s11  ;;  %p901_p8 = scmp.lt.s32.totalorder %s895_s11, %s895_s11 }
  0x38   :  { %749 = vmatprep.subr.bf16.mxu1 %v807_v7  ;;  %v800_v11 = vld [vmem:[#allocation2 + $0x8] sm:$0xff]   ;;  %v801_v12 = vld [vmem:[#allocation2 + $0x10] sm:$0xff]   ;;  %v802_v13 = vld [vmem:[#allocation2 + $0x18] sm:$0xff]  }
  0x39   :  { %750 = vmatpush3.bf16.msra.mxu1 %v807_v7  ;;  %v803_v14 = vld [vmem:[#allocation2 + $0x20] sm:$0xff]   ;;  %v804_v15 = vld [vmem:[#allocation2 + $0x28] sm:$0xff]   ;;  %v805_v16 = vld [vmem:[#allocation2 + $0x30] sm:$0xff]   ;;  %p902_p9 = por %p901_p8, %p900_p7 }
  0x3a   :  { %720 = vmatpush3.bf16.msra.mxu0 %v792_v1  ;;  %751 = vmatprep.subr.bf16.mxu1 %v808_v8  ;;  %v806_v17 = vld [vmem:[#allocation2 + $0x38] sm:$0xff]   ;;  %v809_v18 = vld [vmem:[#allocation8 + $0x28] sm:$0xff]   ;;  %v810_v19 = vld [vmem:[#allocation8 + $0x20] sm:$0xff]  }
  0x3b   :  { %721 = vmatprep.subr.bf16.mxu0 %v793_v2  ;;  %v811_v20 = vld [vmem:[#allocation8 + $0x18] sm:$0xff]   ;;  %v812_v21 = vld [vmem:[#allocation8 + $0x10] sm:$0xff]   ;;  %v813_v22 = vld [vmem:[#allocation8 + $0x8] sm:$0xff]   ;;  %p903_p10 = pnand %p902_p9, %p896_p6 }
  0x3c   :  { %v814_v23 = vld [vmem:[#allocation8] sm:$0xff]   ;;  %v410_v27 = vld [vmem:[#allocation7 + $0x18] sm:$0xff]  ;;  %v408_v29 = vld [vmem:[#allocation7 + $0x8] sm:$0xff] }
  0x3d   :  { %752 = vmatpush3.bf16.msra.mxu1 %v808_v8  ;;  %v407_v26 = vld [vmem:[#allocation7] sm:$0xff]  ;;  %v409_v30 = vld [vmem:[#allocation7 + $0x10] sm:$0xff]  ;;  %v426_v33 = vmul.f32 0.1, %v410_v27  ;;  %v424_v35 = vmul.f32 0.1, %v408_v29 }
  0x3e   :  { %722 = vmatpush3.bf16.msra.mxu0 %v793_v2  ;;  %753 = vmatprep.subr.bf16.mxu1 %v809_v18  ;;  %v423_v32 = vmul.f32 0.1, %v407_v26  ;;  %v425_v39 = vmul.f32 0.1, %v409_v30  ;;  %v411_v45 = vld [vmem:[#allocation7 + $0x20] sm:$0xff]  ;;  %v414_v46 = vld [vmem:[#allocation7 + $0x38] sm:$0xff] }
  0x3f   :  { %723 = vmatprep.subr.bf16.mxu0 %v794_v3  ;;  %v412_v49 = vld [vmem:[#allocation7 + $0x28] sm:$0xff]  ;;  %v413_v51 = vld [vmem:[#allocation7 + $0x30] sm:$0xff]  ;;  %v427_v54 = vmul.f32 0.1, %v411_v45  ;;  %v430_v55 = vmul.f32 0.1, %v414_v46 }
  0x40   :  { %v428_v57 = vmul.f32 0.1, %v412_v49  ;;  %v429_v61 = vmul.f32 0.1, %v413_v51  ;;  %v418_v4 = vld [vmem:[#allocation7 + $0x58] sm:$0xff]  ;;  %v416_v7 = vld [vmem:[#allocation7 + $0x48] sm:$0xff] }
  0x41   :  { %754 = vmatpush3.bf16.msra.mxu1 %v809_v18  ;;  %v422_v26 = vld [vmem:[#allocation7 + $0x78] sm:$0xff]  ;;  %v420_v29 = vld [vmem:[#allocation7 + $0x68] sm:$0xff] }
  0x42   :  { %724 = vmatpush3.bf16.msra.mxu0 %v794_v3  ;;  %755 = vmatprep.subr.bf16.mxu1 %v810_v19  ;;  %v415_v3 = vld [vmem:[#allocation7 + $0x40] sm:$0xff] }
  0x43   :  { %725 = vmatprep.subr.bf16.mxu0 %v795_v5 }
  0x45   :  { %756 = vmatpush3.bf16.msra.mxu1 %v810_v19 }
  0x46   :  { %726 = vmatpush3.bf16.msra.mxu0 %v795_v5  ;;  %757 = vmatprep.subr.bf16.mxu1 %v811_v20 }
  0x47   :  { %727 = vmatprep.subr.bf16.mxu0 %v796_v6 }
  0x49   :  { %758 = vmatpush3.bf16.msra.mxu1 %v811_v20 }
  0x4a   :  { %728 = vmatpush3.bf16.msra.mxu0 %v796_v6  ;;  %759 = vmatprep.subr.bf16.mxu1 %v812_v21 }
  0x4b   :  { %729 = vmatprep.subr.bf16.mxu0 %v797_v9 }
  0x4d   :  { %760 = vmatpush3.bf16.msra.mxu1 %v812_v21 }
  0x4e   :  { %730 = vmatpush3.bf16.msra.mxu0 %v797_v9  ;;  %761 = vmatprep.subr.bf16.mxu1 %v813_v22  ;;  %v417_v9 = vld [vmem:[#allocation7 + $0x50] sm:$0xff] }
  0x4f   :  { %731 = vmatprep.subr.bf16.mxu0 %v798_v10  ;;  %v433_v19 = vmul.f32 0.1, %v417_v9 }
  0x51   :  { %762 = vmatpush3.bf16.msra.mxu1 %v813_v22 }
  0x52   :  { %732 = vmatpush3.bf16.msra.mxu0 %v798_v10  ;;  %763 = vmatprep.subr.bf16.mxu1 %v814_v23 }
  0x55   :  { %734 = vmatmul.mubr.bf16.vlgmr.msra.gmra.mxu0 %v800_v11  ;;  %764 = vmatpush3.bf16.msra.mxu1 %v814_v23 }
  0x56   :  { %737 = vmatprep.mubr.bf16.mxu0 %v801_v12  ;;  %v431_v12 = vmul.f32 0.1, %v415_v3 }
  0x5d   :  { %738 = vmatmul.mubr.bf16.gmra.mxu0 %v802_v13  ;;  %v434_v13 = vmul.f32 0.1, %v418_v4 }
  0x5e   :  { %741 = vmatprep.mubr.bf16.mxu0 %v803_v14 }
  0x65   :  { %742 = vmatmul.mubr.bf16.gmra.mxu0 %v804_v15  ;;  %v432_v15 = vmul.f32 0.1, %v416_v7 }
  0x66   :  { %745 = vmatprep.mubr.bf16.mxu0 %v805_v16 }
  0x6d   :  { %746 = vmatmul.mubr.bf16.gmra.mxu0 %v806_v17 }
 0x115   :  { %v735_v24 = vpop.f32.mrf.mxu0 }
 0x116   :  { %v393_v38 = vmul.f32 0.9, %v735_v24 }
 0x117   :  { %v277_v25 = vpop.f32.mrf.mxu0 }
 0x118   :  { %v391_v34 = vmul.f32 0.9, %v277_v25  ;;  %v441_v48 = vadd.f32 %v425_v39, %v393_v38  ;;  %v419_v25 = vld [vmem:[#allocation7 + $0x60] sm:$0xff] }
 0x119   :  { %v736_v28 = vpop.f32.mrf.mxu0 }
 0x11a   :  { %v394_v36 = vmul.f32 0.9, %v736_v28  ;;  %v439_v43 = vadd.f32 %v423_v32, %v391_v34  ;;  %v435_v34 = vmul.f32 0.1, %v419_v25 }
 0x11b   :  { %v280_v31 = vpop.f32.mrf.mxu0 }
 0x11c   :  { %v392_v40 = vmul.f32 0.9, %v280_v31  ;;  %v442_v42 = vadd.f32 %v426_v33, %v394_v36  ;;  %v421_v31 = vld [vmem:[#allocation7 + $0x70] sm:$0xff] }
 0x11d   :  { %v739_v37 = vpop.f32.mrf.mxu0 }
 0x11e   :  { %v440_v44 = vadd.f32 %v424_v35, %v392_v40  ;;  %v456_v53 = vpack.c.bf16 %v442_v42, %v441_v48  ;;  %v397_v60 = vmul.f32 0.9, %v739_v37  ;;  %v438_v35 = vmul.f32 0.1, %v422_v26 }
 0x11f   :  { %v293_v41 = vpop.f32.mrf.mxu0  ;;  %v436_v37 = vmul.f32 0.1, %v420_v29  ;;  %v437_v40 = vmul.f32 0.1, %v421_v31 }
 0x120   :  { %v455_v50 = vpack.c.bf16 %v440_v44, %v439_v43  ;;  %v395_v56 = vmul.f32 0.9, %v293_v41  ;;  %v445_v6 = vadd.f32 %v429_v61, %v397_v60 }
 0x121   :  { %v740_v47 = vpop.f32.mrf.mxu0 }
 0x122   :  { %765 = vmatprep.mubr.bf16.mxu1 %v455_v50  ;;  %v398_v58 = vmul.f32 0.9, %v740_v47  ;;  %v443_v1 = vadd.f32 %v427_v54, %v395_v56 }
 0x123   :  { %v296_v52 = vpop.f32.mrf.mxu0  ;;  %766 = vmatmul.mubr.bf16.vlgmr.msra.gmra.mxu1 %v456_v53 }
 0x124   :  { %v396_v62 = vmul.f32 0.9, %v296_v52  ;;  %v446_v0 = vadd.f32 %v430_v55, %v398_v58 }
 0x125   :  { %v743_v59 = vpop.f32.mrf.mxu0 }
 0x126   :  { %v444_v2 = vadd.f32 %v428_v57, %v396_v62  ;;  %v458_v11 = vpack.c.bf16 %v446_v0, %v445_v6  ;;  %v401_v18 = vmul.f32 0.9, %v743_v59 }
 0x127   :  { %v309_v63 = vpop.f32.mrf.mxu0 }
 0x128   :  { %v457_v8 = vpack.c.bf16 %v444_v2, %v443_v1  ;;  %v399_v14 = vmul.f32 0.9, %v309_v63  ;;  %v449_v28 = vadd.f32 %v433_v19, %v401_v18 }
 0x129   :  { %v744_v5 = vpop.f32.mrf.mxu0 }
 0x12a   :  { %769 = vmatprep.mubr.bf16.mxu1 %v457_v8  ;;  %v402_v16 = vmul.f32 0.9, %v744_v5  ;;  %v447_v23 = vadd.f32 %v431_v12, %v399_v14 }
 0x12b   :  { %v312_v10 = vpop.f32.mrf.mxu0  ;;  %770 = vmatmul.mubr.bf16.gmra.mxu1 %v458_v11 }
 0x12c   :  { %v400_v20 = vmul.f32 0.9, %v312_v10  ;;  %v450_v22 = vadd.f32 %v434_v13, %v402_v16 }
 0x12d   :  { %v747_v17 = vpop.f32.mrf.mxu0 }
 0x12e   :  { %v448_v24 = vadd.f32 %v432_v15, %v400_v20  ;;  %v460_v33 = vpack.c.bf16 %v450_v22, %v449_v28  ;;  %v405_v39 = vmul.f32 0.9, %v747_v17 }
 0x12f   :  { %v325_v21 = vpop.f32.mrf.mxu0 }
 0x130   :  { %v459_v30 = vpack.c.bf16 %v448_v24, %v447_v23  ;;  %v403_v36 = vmul.f32 0.9, %v325_v21  ;;  %v453_v45 = vadd.f32 %v437_v40, %v405_v39 }
 0x131   :  { %v748_v27 = vpop.f32.mrf.mxu0 }
 0x132   :  { %773 = vmatprep.mubr.bf16.mxu1 %v459_v30  ;;  %v406_v38 = vmul.f32 0.9, %v748_v27  ;;  %v451_v43 = vadd.f32 %v435_v34, %v403_v36 }
 0x133   :  { %v328_v32 = vpop.f32.mrf.mxu0  ;;  %774 = vmatmul.mubr.bf16.gmra.mxu1 %v460_v33 }
 0x134   :  { %v404_v41 = vmul.f32 0.9, %v328_v32  ;;  %v454_v42 = vadd.f32 %v438_v35, %v406_v38 }
 0x136   :  { %v452_v44 = vadd.f32 %v436_v37, %v404_v41  ;;  %v462_v47 = vpack.c.bf16 %v454_v42, %v453_v45 }
 0x138   :  { %v461_v46 = vpack.c.bf16 %v452_v44, %v451_v43 }
 0x13a   :  { %777 = vmatprep.mubr.bf16.mxu1 %v461_v46 }
 0x13b   :  { %778 = vmatmul.mubr.bf16.gmra.mxu1 %v462_v47 }
 0x1e3   :  { %v767_v48 = vpop.f32.mrf.mxu1 }
 0x1e4   :  { %626 = vst [vmem:[#allocation10 + $0x10] sm:$0xff] %v767_v48 }
 0x1e5   :  { %v561_v49 = vpop.f32.mrf.mxu1 }
 0x1e6   :  { %624 = vst [vmem:[#allocation10] sm:$0xff] %v561_v49 }
 0x1e7   :  { %v768_v50 = vpop.f32.mrf.mxu1 }
 0x1e8   :  { %627 = vst [vmem:[#allocation10 + $0x18] sm:$0xff] %v768_v50 }
 0x1e9   :  { %v564_v51 = vpop.f32.mrf.mxu1 }
 0x1ea   :  { %625 = vst [vmem:[#allocation10 + $0x8] sm:$0xff] %v564_v51 }
 0x1eb   :  { %v771_v52 = vpop.f32.mrf.mxu1 }
 0x1ec   :  { %630 = vst [vmem:[#allocation10 + $0x30] sm:$0xff] %v771_v52 }
 0x1ed   :  { %v577_v53 = vpop.f32.mrf.mxu1 }
 0x1ee   :  { %628 = vst [vmem:[#allocation10 + $0x20] sm:$0xff] %v577_v53 }
 0x1ef   :  { %v772_v54 = vpop.f32.mrf.mxu1 }
 0x1f0   :  { %631 = vst [vmem:[#allocation10 + $0x38] sm:$0xff] %v772_v54 }
 0x1f1   :  { %v580_v55 = vpop.f32.mrf.mxu1 }
 0x1f2   :  { %629 = vst [vmem:[#allocation10 + $0x28] sm:$0xff] %v580_v55 }
 0x1f3   :  { %v775_v56 = vpop.f32.mrf.mxu1 }
 0x1f4   :  { %634 = vst [vmem:[#allocation10 + $0x50] sm:$0xff] %v775_v56 }
 0x1f5   :  { %v593_v57 = vpop.f32.mrf.mxu1 }
 0x1f6   :  { %632 = vst [vmem:[#allocation10 + $0x40] sm:$0xff] %v593_v57 }
 0x1f7   :  { %v776_v58 = vpop.f32.mrf.mxu1 }
 0x1f8   :  { %635 = vst [vmem:[#allocation10 + $0x58] sm:$0xff] %v776_v58 }
 0x1f9   :  { %v596_v59 = vpop.f32.mrf.mxu1 }
 0x1fa   :  { %633 = vst [vmem:[#allocation10 + $0x48] sm:$0xff] %v596_v59 }
 0x1fb   :  { %v779_v60 = vpop.f32.mrf.mxu1 }
 0x1fc   :  { %638 = vst [vmem:[#allocation10 + $0x70] sm:$0xff] %v779_v60 }
 0x1fd   :  { %v609_v61 = vpop.f32.mrf.mxu1 }
 0x1fe   :  { %636 = vst [vmem:[#allocation10 + $0x60] sm:$0xff] %v609_v61 }
 0x1ff   :  { %v780_v62 = vpop.f32.mrf.mxu1 }
 0x200   :  { %639 = vst [vmem:[#allocation10 + $0x78] sm:$0xff] %v780_v62 }
 0x201   :  { %v612_v63 = vpop.f32.mrf.mxu1 }
 0x202   :  { %637 = vst [vmem:[#allocation10 + $0x68] sm:$0xff] %v612_v63 }
 0x203   :  { %906 = shalt.err (!%p903_p10)
}
 0x204   :  { %651 = dma.vmem_to_hbm [thread:$0]  %s646_s3, 2048, %s991_s4, [#allocation4], %s928_s1, %s928_s1, %s929_s30  }
 0x205   :  { %921 = dma.done.wait [#allocation4], 2048  }
 0x206   :  { %922 = vsyncadd [#allocation4], 4294965248 }
 0x207   :  { %655 = vsyncpa [#allocation3], 1 }
 0x208   :  { %656 = vsyncpa [#allocation6], 1 }
 0x209   :  { %657 = vsyncpa [#allocation9], 1 }
 0x20a   :  { %658 = vsyncpa [#allocation4], 1 }

</bundles_post_ra>
